<compile_context>
chip_gen: v5e
topology: v5e:2x2
jax: 0.10.0
libtpu: 0.0.40
codegen_flags: <defaults>
</compile_context>

<pallas_src>
import jax
import jax.numpy as jnp
from jax.experimental import pallas as pl
from jax.experimental.pallas import tpu as pltpu


_VMEM_BLOCK_BUDGET = 4 * 1024 * 1024    # in+out bytes per grid step
_KRON_WEIGHT_BUDGET = 4 * 1024 * 1024   # max bytes for the expanded weight


# --------------------- Path A: lane-dense flattened matmul ------------------

def _flat_kernel(x_ref, w_ref, b_ref, o_ref):
    # x_ref: [Gr, D*N]   rows = (b, v) slabs, lanes = flattened (d, n)
    # w_ref: [D*N, P*N]  kron(W, I_N)^T, resident across grid steps
    # b_ref: [1, P*N]    bias repeated per patch position
    # o_ref: [Gr, P*N]   lanes = flattened (p, n) == final [B, V, P, N] layout
    acc = jnp.dot(x_ref[...], w_ref[...], preferred_element_type=jnp.float32)
    o_ref[...] = (acc + b_ref[...].astype(jnp.float32)).astype(o_ref.dtype)


# --------------------- Path B: per-(b, v)-slab matmul -----------------------

def _slab_kernel(x_ref, w_ref, b_ref, o_ref):
    # x_ref: [G, D, tn], w_ref: [P, D], b_ref: [P, 1], o_ref: [G, P, tn]
    w = w_ref[...]
    # Hoist the bias broadcast out of the slab loop (JAX does not CSE it).
    b = jnp.broadcast_to(b_ref[...].astype(jnp.float32),
                         (o_ref.shape[1], o_ref.shape[2]))
    for g in range(x_ref.shape[0]):          # small static unroll (G <= 8)
        acc = jnp.dot(w, x_ref[g], preferred_element_type=jnp.float32)
        o_ref[g] = (acc + b).astype(o_ref.dtype)


# --------------------------------- Wrapper ----------------------------------

def pretrain_head(x, weight, bias):
    """Forward pass of PITS PretrainHead (eval mode).

    x:      [B, V, D, N]  (D = d_model, N = num_patch)
    weight: [P, D]        nn.Linear(d_model, patch_len).weight
    bias:   [P]           nn.Linear(d_model, patch_len).bias
    returns [B, V, P, N]
    """
    B, V, D, N = x.shape
    P = weight.shape[0]
    BV = B * V
    itemsize = x.dtype.itemsize

    # TODO(synk): nn.Dropout is identity in eval mode; training-mode dropout
    # (stochastic masking of activations) is not implemented here.

    hbm_bytes = (itemsize * BV * N * (D + P)
                 + weight.size * weight.dtype.itemsize
                 + bias.size * bias.dtype.itemsize)

    kron_bytes = (D * N) * (P * N) * weight.dtype.itemsize
    use_flat = (N < 128) and (kron_bytes <= _KRON_WEIGHT_BUDGET)

    if use_flat:
        DN, PN = D * N, P * N
        x2 = x.reshape(BV, DN)                 # free contiguous reshape
        # kron(W, I_N)[p*N + n, d*N + n'] = W[p, d] * (n == n'); transpose so
        # the kernel matmul needs no in-kernel transpose.
        wk = jnp.kron(weight, jnp.eye(N, dtype=weight.dtype)).T   # [DN, PN]
        bflat = jnp.repeat(bias, N).reshape(1, PN)                # [1, PN]

        per_row = (DN + PN) * itemsize
        gr = max(8, (_VMEM_BLOCK_BUDGET // max(1, per_row)) // 8 * 8)
        gr = min(gr, BV)                        # == BV (full dim) when BV small
        grid = (pl.cdiv(BV, gr),)

        out2 = pl.pallas_call(
            _flat_kernel,
            out_shape=jax.ShapeDtypeStruct((BV, PN), x.dtype),
            grid=grid,
            in_specs=[
                pl.BlockSpec((gr, DN), lambda i: (i, 0)),
                pl.BlockSpec((DN, PN), lambda i: (0, 0)),
                pl.BlockSpec((1, PN), lambda i: (0, 0)),
            ],
            out_specs=pl.BlockSpec((gr, PN), lambda i: (i, 0)),
            compiler_params=pltpu.CompilerParams(
                dimension_semantics=("parallel",)),
            cost_estimate=pl.CostEstimate(
                flops=2 * BV * DN * PN,
                transcendentals=0,
                bytes_accessed=hbm_bytes),
        )(x2, wk, bflat)
        return out2.reshape(B, V, P, N)        # free leading-dim unflatten

    # ----- Path B: tiled per-slab matmul -------------------------------------
    x3 = x.reshape(BV, D, N)                   # free leading-dim flatten
    b2 = bias.reshape(P, 1)

    if N >= 128:
        n_tile = min((N // 128) * 128, 2048)   # lane-dense tiles
    else:
        n_tile = N   # rare fallback (kron too large); lane-sparse but correct

    slab_bytes = (D + P) * n_tile * itemsize
    g = max(1, min(BV, 8, _VMEM_BLOCK_BUDGET // max(1, slab_bytes)))
    grid = (pl.cdiv(BV, g), pl.cdiv(N, n_tile))

    out3 = pl.pallas_call(
        _slab_kernel,
        out_shape=jax.ShapeDtypeStruct((BV, P, N), x.dtype),
        grid=grid,
        in_specs=[
            pl.BlockSpec((g, D, n_tile), lambda i, j: (i, 0, j)),
            pl.BlockSpec((P, D), lambda i, j: (0, 0)),
            pl.BlockSpec((P, 1), lambda i, j: (0, 0)),
        ],
        out_specs=pl.BlockSpec((g, P, n_tile), lambda i, j: (i, 0, j)),
        compiler_params=pltpu.CompilerParams(
            dimension_semantics=("parallel", "parallel")),
        cost_estimate=pl.CostEstimate(
            flops=2 * BV * P * D * N,
            transcendentals=0,
            bytes_accessed=hbm_bytes),
    )(x3, weight, b2)
    return out3.reshape(B, V, P, N)


def _reference(x, weight, bias):
    # transpose -> linear -> permute collapses to this einsum in native layout.
    return jnp.einsum("bvdn,pd->bvpn", x, weight) + bias[None, None, :, None]


if __name__ == "__main__":
    fwd = jax.jit(pretrain_head)
    key = jax.random.PRNGKey(0)

    # ---- Test 1: module-consistent small shapes (small num_patch -> Path A) --
    B, V, d_model, num_patch, patch_len = 2, 4, 32, 8, 16
    k1, k2, k3, key = jax.random.split(key, 4)
    x = jax.random.normal(k1, (B, V, d_model, num_patch), dtype=jnp.float32)
    weight = jax.random.normal(k2, (patch_len, d_model), dtype=jnp.float32) * 0.02
    bias = jax.random.normal(k3, (patch_len,), dtype=jnp.float32) * 0.02

    out = jax.block_until_ready(fwd(x, weight, bias))
    ref = _reference(x, weight, bias)
    assert out.shape == (B, V, patch_len, num_patch)
    assert jnp.allclose(out, ref, atol=1e-4, rtol=1e-4), float(
        jnp.max(jnp.abs(out - ref)))

    # ---- Test 2: large num_patch (lane-dense tiled Path B) -------------------
    B2, V2, d2, n2, p2 = 2, 2, 32, 128, 16
    k1, k2, k3, key = jax.random.split(key, 4)
    x2 = jax.random.normal(k1, (B2, V2, d2, n2), dtype=jnp.float32)
    w2 = jax.random.normal(k2, (p2, d2), dtype=jnp.float32) * 0.02
    b2 = jax.random.normal(k3, (p2,), dtype=jnp.float32) * 0.02

    out2 = jax.block_until_ready(fwd(x2, w2, b2))
    ref2 = _reference(x2, w2, b2)
    assert out2.shape == (B2, V2, p2, n2)
    assert jnp.allclose(out2, ref2, atol=1e-4, rtol=1e-4), float(
        jnp.max(jnp.abs(out2 - ref2)))

    print("KERNEL_OK")
</pallas_src>

<mosaic_0001>
module attributes {stable_mosaic.version = 11 : i64} {
  func.func @_flat_kernel(%arg0: i32, %arg1: memref<8x256xf32, #tpu.memory_space<vmem>>, %arg2: memref<256x128xf32, #tpu.memory_space<vmem>>, %arg3: memref<1x128xf32, #tpu.memory_space<vmem>>, %arg4: memref<8x128xf32, #tpu.memory_space<vmem>>) attributes {dimension_semantics = [#tpu.dimension_semantics<parallel>], iteration_bounds = array<i64: 1>, scalar_prefetch = 0 : i64, scratch_operands = 0 : i64, tpu.core_type = #tpu.core_type<tc>, window_params = [{transform_indices = @transform_0, window_bounds = array<i64: 8, 256>}, {pipeline_mode = #tpu.pipeline_mode<synchronous>, transform_indices = @transform_1, window_bounds = array<i64: 256, 128>}, {pipeline_mode = #tpu.pipeline_mode<synchronous>, transform_indices = @transform_2, window_bounds = array<i64: 1, 128>}, {transform_indices = @transform_3, window_bounds = array<i64: 8, 128>}]} {
    %c0 = arith.constant 0 : index
    %c0_0 = arith.constant 0 : index
    %0 = vector.load %arg1[%c0, %c0_0] : memref<8x256xf32, #tpu.memory_space<vmem>>, vector<8x256xf32>
    %c0_1 = arith.constant 0 : index
    %c0_2 = arith.constant 0 : index
    %1 = vector.load %arg2[%c0_1, %c0_2] : memref<256x128xf32, #tpu.memory_space<vmem>>, vector<256x128xf32>
    %cst = arith.constant dense<0.000000e+00> : vector<8x128xf32>
    %2 = tpu.matmul %0, %1, %cst {dimension_numbers = #tpu.dot_dimension_numbers<[1], [0], [0], [1], [0, 0, 1, 1], [], []>} : vector<8x256xf32>, vector<256x128xf32>, vector<8x128xf32> -> vector<8x128xf32>
    %c0_3 = arith.constant 0 : index
    %c0_4 = arith.constant 0 : index
    %3 = vector.load %arg3[%c0_3, %c0_4] : memref<1x128xf32, #tpu.memory_space<vmem>>, vector<1x128xf32>
    %4 = vector.broadcast %3 : vector<1x128xf32> to vector<8x128xf32>
    %5 = arith.addf %2, %4 : vector<8x128xf32>
    %c0_5 = arith.constant 0 : index
    %c0_6 = arith.constant 0 : index
    %6 = vector.load %arg4[%c0_5, %c0_6] : memref<8x128xf32, #tpu.memory_space<vmem>>, vector<8x128xf32>
    tpu.vector_store %arg4[%c0_5, %c0_6], %5 {strides = array<i32>} : memref<8x128xf32, #tpu.memory_space<vmem>>, vector<8x128xf32>,
    return
  }
  func.func @transform_0(%arg0: i32) -> (i32, i32) {
    %c0_i32 = arith.constant 0 : i32
    %c0_i32_0 = arith.constant 0 : i32
    return %arg0, %c0_i32 : i32, i32
  }
  func.func @transform_1(%arg0: i32) -> (i32, i32) {
    %c0_i32 = arith.constant 0 : i32
    %c0_i32_0 = arith.constant 0 : i32
    %c0_i32_1 = arith.constant 0 : i32
    return %c0_i32, %c0_i32_0 : i32, i32
  }
  func.func @transform_2(%arg0: i32) -> (i32, i32) {
    %c0_i32 = arith.constant 0 : i32
    %c0_i32_0 = arith.constant 0 : i32
    %c0_i32_1 = arith.constant 0 : i32
    return %c0_i32, %c0_i32_0 : i32, i32
  }
  func.func @transform_3(%arg0: i32) -> (i32, i32) {
    %c0_i32 = arith.constant 0 : i32
    %c0_i32_0 = arith.constant 0 : i32
    return %arg0, %c0_i32 : i32, i32
  }
}

</mosaic_0001>

<bundles_post_ra>
// kernel: pretrain_head.1
= control target key start
LH: loop header
LB: loop body
LE: loop exit
PB: predicated region body
PF: predicated region fallthrough
CT: control target
= control target key end

     0   :  { %s226_s1 = inlined_call_operand.vmem [shape: f32[256,128], index: 1, kind: input, shape index: {}]   ;;  %s227_s2 = inlined_call_operand.vmem [shape: f32[1,128], index: 2, kind: input, shape index: {}]   ;;  %s228_s0 = inlined_call_operand.vmem [shape: f32[8,256], index: 0, kind: input, shape index: {}]   ;;  %s229_s3 = inlined_call_operand.vmem [shape: f32[8,128], index: 3, kind: output, shape index: {}]  }
   0x1   :  { %v31_v0 = vld [vmem:[%s226_s1 + $0x78] sm:$0xff]  ;;  %v30_v1 = vld [vmem:[%s226_s1 + $0x70] sm:$0xff]  ;;  %v29_v4 = vld [vmem:[%s226_s1 + $0x68] sm:$0xff] }
   0x2   :  { %v47_v2 = vld [vmem:[%s226_s1 + $0xf8] sm:$0xff]  ;;  %52 = vmatpush.msra.mxu0 %v31_v0  ;;  %v46_v3 = vld [vmem:[%s226_s1 + $0xf0] sm:$0xff]  ;;  %v45_v5 = vld [vmem:[%s226_s1 + $0xe8] sm:$0xff] }
   0x3   :  { %72 = vmatpush.msra.mxu1 %v47_v2  ;;  %v28_v6 = vld [vmem:[%s226_s1 + $0x60] sm:$0xff]  ;;  %v27_v8 = vld [vmem:[%s226_s1 + $0x58] sm:$0xff]  ;;  %v26_v10 = vld [vmem:[%s226_s1 + $0x50] sm:$0xff] }
   0x4   :  { %53 = vmatpush.msra.mxu0 %v30_v1  ;;  %v44_v7 = vld [vmem:[%s226_s1 + $0xe0] sm:$0xff]  ;;  %v43_v9 = vld [vmem:[%s226_s1 + $0xd8] sm:$0xff]  ;;  %v42_v11 = vld [vmem:[%s226_s1 + $0xd0] sm:$0xff] }
   0x5   :  { %73 = vmatpush.msra.mxu1 %v46_v3  ;;  %v25_v12 = vld [vmem:[%s226_s1 + $0x48] sm:$0xff]  ;;  %v24_v14 = vld [vmem:[%s226_s1 + $0x40] sm:$0xff]  ;;  %v23_v16 = vld [vmem:[%s226_s1 + $0x38] sm:$0xff] }
   0x6   :  { %54 = vmatpush.msra.mxu0 %v29_v4  ;;  %v41_v13 = vld [vmem:[%s226_s1 + $0xc8] sm:$0xff]  ;;  %v40_v15 = vld [vmem:[%s226_s1 + $0xc0] sm:$0xff]  ;;  %v39_v17 = vld [vmem:[%s226_s1 + $0xb8] sm:$0xff] }
   0x7   :  { %74 = vmatpush.msra.mxu1 %v45_v5  ;;  %v22_v18 = vld [vmem:[%s226_s1 + $0x30] sm:$0xff]  ;;  %v21_v20 = vld [vmem:[%s226_s1 + $0x28] sm:$0xff]  ;;  %v20_v22 = vld [vmem:[%s226_s1 + $0x20] sm:$0xff] }
   0x8   :  { %55 = vmatpush.msra.mxu0 %v28_v6  ;;  %v38_v19 = vld [vmem:[%s226_s1 + $0xb0] sm:$0xff]  ;;  %v37_v21 = vld [vmem:[%s226_s1 + $0xa8] sm:$0xff]  ;;  %v36_v23 = vld [vmem:[%s226_s1 + $0xa0] sm:$0xff] }
   0x9   :  { %75 = vmatpush.msra.mxu1 %v44_v7  ;;  %v19_v24 = vld [vmem:[%s226_s1 + $0x18] sm:$0xff]  ;;  %v18_v26 = vld [vmem:[%s226_s1 + $0x10] sm:$0xff]  ;;  %v17_v28 = vld [vmem:[%s226_s1 + $0x8] sm:$0xff] }
   0xa   :  { %56 = vmatpush.msra.mxu0 %v27_v8  ;;  %v35_v25 = vld [vmem:[%s226_s1 + $0x98] sm:$0xff]  ;;  %v34_v27 = vld [vmem:[%s226_s1 + $0x90] sm:$0xff]  ;;  %v33_v29 = vld [vmem:[%s226_s1 + $0x88] sm:$0xff] }
   0xb   :  { %76 = vmatpush.msra.mxu1 %v43_v9  ;;  %v16_v30 = vld [vmem:[%s226_s1] sm:$0xff]  ;;  %v15_v33 = vld [vmem:[%s228_s0 + $0x8] sm:$0xff] }
   0xc   :  { %57 = vmatpush.msra.mxu0 %v26_v10  ;;  %v32_v31 = vld [vmem:[%s226_s1 + $0x80] sm:$0xff] }
   0xd   :  { %77 = vmatpush.msra.mxu1 %v42_v11  ;;  %v14_v32 = vld [vmem:[%s228_s0] sm:$0xff] }
   0xe   :  { %58 = vmatpush.msra.mxu0 %v25_v12  ;;  %v97_v34 = vld [vmem:[%s227_s2] ss:$0 sm:$0xff] }
   0xf   :  { %78 = vmatpush.msra.mxu1 %v41_v13 }
  0x10   :  { %59 = vmatpush.msra.mxu0 %v24_v14 }
  0x11   :  { %79 = vmatpush.msra.mxu1 %v40_v15 }
  0x12   :  { %60 = vmatpush.msra.mxu0 %v23_v16 }
  0x13   :  { %80 = vmatpush.msra.mxu1 %v39_v17 }
  0x14   :  { %61 = vmatpush.msra.mxu0 %v22_v18 }
  0x15   :  { %81 = vmatpush.msra.mxu1 %v38_v19 }
  0x16   :  { %62 = vmatpush.msra.mxu0 %v21_v20 }
  0x17   :  { %82 = vmatpush.msra.mxu1 %v37_v21 }
  0x18   :  { %63 = vmatpush.msra.mxu0 %v20_v22 }
  0x19   :  { %83 = vmatpush.msra.mxu1 %v36_v23 }
  0x1a   :  { %64 = vmatpush.msra.mxu0 %v19_v24 }
  0x1b   :  { %84 = vmatpush.msra.mxu1 %v35_v25 }
  0x1c   :  { %65 = vmatpush.msra.mxu0 %v18_v26 }
  0x1d   :  { %85 = vmatpush.msra.mxu1 %v34_v27 }
  0x1e   :  { %66 = vmatpush.msra.mxu0 %v17_v28 }
  0x1f   :  { %86 = vmatpush.msra.mxu1 %v33_v29 }
  0x20   :  { %67 = vmatpush.msra.mxu0 %v16_v30 }
  0x21   :  { %87 = vmatpush.msra.mxu1 %v32_v31  ;;  %68 = vmatmul.f32.vlgmr.msra.gmra.mxu0 %v14_v32 }
  0x22   :  { %88 = vmatmul.f32.vlgmr.msra.gmra.mxu1 %v15_v33 }
  0x9e   :  { %v69_v35 = vpop.f32.mrf.mxu0 }
  0x9f   :  { %v89_v36 = vpop.f32.mrf.mxu1  ;;  %v70_v37 = vadd.f32 %v97_v34, %v69_v35 }
  0xa1   :  { %v90_v38 = vadd.f32 %v89_v36, %v70_v37 }
  0xa3   :  { %92 = vst [vmem:[%s229_s3] sm:$0xff] %v90_v38 }

</bundles_post_ra>
